<compile_context>
chip_gen: v5e
topology: v5e:2x2
jax: 0.10.0
libtpu: 0.0.40
codegen_flags: <defaults>
</compile_context>

<pallas_src>
import functools

import jax
import jax.numpy as jnp
from jax.experimental import pallas as pl
from jax.experimental.pallas import tpu as pltpu

LANES = 128


def _round_up(x, m):
    return (x + m - 1) // m * m


def _num_tensorcores():
    """2 TensorCores per chip on v7x (and megacore v4/v5p), 1 on v5e/v6e."""
    try:
        kind = jax.devices()[0].device_kind.lower()
    except Exception:
        return 1
    return 2 if any(t in kind for t in ("v7", "v5p", "v4")) else 1


def _ann_kernel(x_ref, w1_ref, b1_ref, w2_ref, b2_ref, w3_ref, b3_ref,
                w4_ref, b4_ref, o_ref, *, activation: str):
    """Fused 4-layer MLP forward for one batch tile; everything resident in VMEM."""
    if activation == "relu":
        act = lambda v: jnp.maximum(v, 0.0)
    elif activation == "gelu":
        # TODO(synk): PyTorch F.gelu defaults to the exact erf form; the tanh
        # approximation is used here for guaranteed Mosaic lowering (~1e-3 diff).
        act = lambda v: jax.nn.gelu(v, approximate=True)
    else:
        raise ValueError("Invalid activation function. Choose 'relu' or 'gelu'.")

    def layer(h, w_ref, b_ref):
        # Operands in the storage/compute dtype (bf16 by default), f32 accumulation
        # on the MXU; bias add and activation run on the f32 accumulator.
        acc = jnp.dot(h.astype(w_ref.dtype), w_ref[...],
                      preferred_element_type=jnp.float32)
        return acc + b_ref[...].astype(jnp.float32)

    h = act(layer(x_ref[...], w1_ref, b1_ref))
    h = act(layer(h, w2_ref, b2_ref))
    h = act(layer(h, w3_ref, b3_ref))
    out = layer(h, w4_ref, b4_ref)          # last layer padded to 128 MXU columns

    # Write back only the real output columns (unpadded HBM writeback).
    o_ref[...] = out[:, :o_ref.shape[1]].astype(o_ref.dtype)


def ann_forward(x, params, *, activation="relu", batch_tile=1024,
                compute_dtype=jnp.bfloat16):
    """x: [B, D_in]. params: dict of w1..w4 ([in,out]) and b1..b4 ([1,out])."""
    B, D_in = x.shape
    out_dtype = x.dtype                      # public output keeps the input dtype (f32)

    w1, b1 = params["w1"], params["b1"]
    w2, b2 = params["w2"], params["b2"]
    w3, b3 = params["w3"], params["b3"]
    w4, b4 = params["w4"], params["b4"]
    D_out = w4.shape[1]

    # Pad the last layer's weights/bias to a full 128-lane width so the final matmul
    # is MXU-friendly; the padded columns are dropped inside the kernel before the store.
    D_out_p = _round_up(max(D_out, LANES), LANES)
    if D_out_p != D_out:
        w4 = jnp.pad(w4, ((0, 0), (0, D_out_p - D_out)))
        b4 = jnp.pad(b4, ((0, 0), (0, D_out_p - D_out)))

    # bf16 inputs/weights halve the dominant DMA bytes; accumulation stays f32.
    if compute_dtype is not None:
        x = x.astype(compute_dtype)
        w1, w2, w3, w4 = (w.astype(compute_dtype) for w in (w1, w2, w3, w4))

    # Batch tile: as large as the batch allows (multiple of 8 f32/bf16-safe sublanes).
    tb = _round_up(min(batch_tile, _round_up(B, 8)), 8)
    num_cores = _num_tensorcores()
    if num_cores > 1:
        # Megacore: aim for >=2 grid steps per TensorCore so each core can prefetch
        # tile i+1 while computing tile i. Single-TC chips keep the biggest tile.
        while (pl.cdiv(B, tb) < 2 * num_cores) and tb % 16 == 0 and tb > 8:
            tb //= 2
    Bp = _round_up(B, tb)
    grid = (Bp // tb,)
    if Bp != B:
        x = jnp.pad(x, ((0, Bp - B), (0, 0)))

    # Constant index_map => weight/bias blocks stay resident; DMA issued once.
    full = lambda a: pl.BlockSpec(a.shape, lambda i: (0, 0))

    h1, h2, h3 = w1.shape[1], w2.shape[1], w3.shape[1]
    flops = 2 * Bp * (D_in * h1 + h1 * h2 + h2 * h3 + h3 * D_out_p)
    transcendentals = Bp * (h1 + h2 + h3) if activation == "gelu" else 0
    bytes_accessed = int(
        x.size * x.dtype.itemsize
        + Bp * D_out * jnp.dtype(out_dtype).itemsize
        + sum(a.size * a.dtype.itemsize for a in (w1, b1, w2, b2, w3, b3, w4, b4)))

    # Rough VMEM footprint (double-buffered x/out tiles + weights + f32 intermediates).
    csize = x.dtype.itemsize
    vmem_est = (2 * tb * D_in * csize                       # x tiles
                + 2 * tb * D_out * jnp.dtype(out_dtype).itemsize   # out tiles
                + 2 * sum(a.size * a.dtype.itemsize
                          for a in (w1, b1, w2, b2, w3, b3, w4, b4))
                + tb * (h1 + h2 + h3 + D_out_p) * 4)        # f32 intermediates
    vmem_limit = int(min(2 * vmem_est, 48 * 1024 * 1024)) if vmem_est > 12 * 1024 * 1024 else None

    kernel = functools.partial(_ann_kernel, activation=activation)

    out_p = pl.pallas_call(
        kernel,
        out_shape=jax.ShapeDtypeStruct((Bp, D_out), out_dtype),
        grid_spec=pl.GridSpec(
            grid=grid,
            in_specs=[
                pl.BlockSpec((tb, D_in), lambda i: (i, 0)),   # pipelined x tile
                full(w1), full(b1),
                full(w2), full(b2),
                full(w3), full(b3),
                full(w4), full(b4),
            ],
            out_specs=pl.BlockSpec((tb, D_out), lambda i: (i, 0)),
        ),
        compiler_params=pltpu.CompilerParams(
            dimension_semantics=("parallel",),
            vmem_limit_bytes=vmem_limit),
        cost_estimate=pl.CostEstimate(
            flops=flops,
            transcendentals=transcendentals,
            bytes_accessed=bytes_accessed),
    )(x, w1, b1, w2, b2, w3, b3, w4, b4)

    return out_p[:B]


def init_params(key, input_size):
    """Deterministic synthetic parameters matching nn.Linear shapes (stored transposed)."""
    dims = [(input_size, 64), (64, 64), (64, 32), (32, 4)]
    params = {}
    for idx, (fan_in, fan_out) in enumerate(dims, start=1):
        key, kw, kb = jax.random.split(key, 3)
        bound = 1.0 / jnp.sqrt(fan_in)
        params[f"w{idx}"] = jax.random.uniform(
            kw, (fan_in, fan_out), jnp.float32, -bound, bound)
        params[f"b{idx}"] = jax.random.uniform(
            kb, (1, fan_out), jnp.float32, -bound, bound)
    return params


def ann_reference(x, params, activation="relu"):
    if activation == "relu":
        act = lambda v: jnp.maximum(v, 0.0)
    else:
        act = lambda v: jax.nn.gelu(v, approximate=True)
    h = act(x @ params["w1"] + params["b1"])
    h = act(h @ params["w2"] + params["b2"])
    h = act(h @ params["w3"] + params["b3"])
    return h @ params["w4"] + params["b4"]


if __name__ == "__main__":
    key = jax.random.PRNGKey(0)
    key, kx = jax.random.split(key)

    batch, input_size = 64, 32
    x = jax.random.normal(kx, (batch, input_size), jnp.float32)
    params = init_params(key, input_size)

    # 1) relu in f32 compute: bit-accurate check of the fused kernel math.
    out = ann_forward(x, params, activation="relu", compute_dtype=jnp.float32)
    out = jax.block_until_ready(out)
    ref = ann_reference(x, params, "relu")
    assert out.shape == (batch, 4), out.shape
    assert out.dtype == jnp.float32, out.dtype
    assert jnp.allclose(out, ref, atol=1e-5, rtol=1e-5), "relu/f32 mismatch vs reference"

    # 2) gelu with default bf16 compute + non-divisible batch (padding / masked tail).
    x_odd = x[:37]
    out_g = ann_forward(x_odd, params, activation="gelu")
    out_g = jax.block_until_ready(out_g)
    ref_g = ann_reference(x_odd, params, "gelu")
    assert out_g.shape == (37, 4), out_g.shape
    assert out_g.dtype == jnp.float32, out_g.dtype
    assert jnp.allclose(out_g, ref_g, atol=5e-2, rtol=5e-2), "gelu/bf16 mismatch vs reference"

    # 3) relu with default bf16 compute and a batch large enough for a multi-step grid.
    key, kb = jax.random.split(key)
    x_big = jax.random.normal(kb, (2176, input_size), jnp.float32)
    out_b = ann_forward(x_big, params, activation="relu")
    out_b = jax.block_until_ready(out_b)
    ref_b = ann_reference(x_big, params, "relu")
    assert out_b.shape == (2176, 4), out_b.shape
    assert jnp.allclose(out_b, ref_b, atol=5e-2, rtol=5e-2), "relu/bf16 multi-tile mismatch"

    print("KERNEL_OK")
</pallas_src>

<mosaic_0001>
module attributes {stable_mosaic.version = 11 : i64} {
  func.func @_ann_kernel(%arg0: i32, %arg1: memref<64x32xf32, #tpu.memory_space<vmem>>, %arg2: memref<32x64xf32, #tpu.memory_space<vmem>>, %arg3: memref<1x64xf32, #tpu.memory_space<vmem>>, %arg4: memref<64x64xf32, #tpu.memory_space<vmem>>, %arg5: memref<1x64xf32, #tpu.memory_space<vmem>>, %arg6: memref<64x32xf32, #tpu.memory_space<vmem>>, %arg7: memref<1x32xf32, #tpu.memory_space<vmem>>, %arg8: memref<32x128xf32, #tpu.memory_space<vmem>>, %arg9: memref<1x128xf32, #tpu.memory_space<vmem>>, %arg10: memref<64x4xf32, #tpu.memory_space<vmem>>) attributes {dimension_semantics = [#tpu.dimension_semantics<parallel>], iteration_bounds = array<i64: 1>, scalar_prefetch = 0 : i64, scratch_operands = 0 : i64, tpu.core_type = #tpu.core_type<tc>, window_params = [{transform_indices = @transform_0, window_bounds = array<i64: 64, 32>}, {pipeline_mode = #tpu.pipeline_mode<synchronous>, transform_indices = @transform_1, window_bounds = array<i64: 32, 64>}, {pipeline_mode = #tpu.pipeline_mode<synchronous>, transform_indices = @transform_2, window_bounds = array<i64: 1, 64>}, {pipeline_mode = #tpu.pipeline_mode<synchronous>, transform_indices = @transform_3, window_bounds = array<i64: 64, 64>}, {pipeline_mode = #tpu.pipeline_mode<synchronous>, transform_indices = @transform_4, window_bounds = array<i64: 1, 64>}, {pipeline_mode = #tpu.pipeline_mode<synchronous>, transform_indices = @transform_5, window_bounds = array<i64: 64, 32>}, {pipeline_mode = #tpu.pipeline_mode<synchronous>, transform_indices = @transform_6, window_bounds = array<i64: 1, 32>}, {pipeline_mode = #tpu.pipeline_mode<synchronous>, transform_indices = @transform_7, window_bounds = array<i64: 32, 128>}, {pipeline_mode = #tpu.pipeline_mode<synchronous>, transform_indices = @transform_8, window_bounds = array<i64: 1, 128>}, {transform_indices = @transform_9, window_bounds = array<i64: 64, 4>}]} {
    %c0 = arith.constant 0 : index
    %c0_0 = arith.constant 0 : index
    %0 = vector.load %arg1[%c0, %c0_0] : memref<64x32xf32, #tpu.memory_space<vmem>>, vector<64x32xf32>
    %c0_1 = arith.constant 0 : index
    %c0_2 = arith.constant 0 : index
    %1 = vector.load %arg2[%c0_1, %c0_2] : memref<32x64xf32, #tpu.memory_space<vmem>>, vector<32x64xf32>
    %cst = arith.constant dense<0.000000e+00> : vector<64x64xf32>
    %2 = tpu.matmul %0, %1, %cst {dimension_numbers = #tpu.dot_dimension_numbers<[1], [0], [0], [1], [0, 0, 1, 1], [], []>} : vector<64x32xf32>, vector<32x64xf32>, vector<64x64xf32> -> vector<64x64xf32>
    %c0_3 = arith.constant 0 : index
    %c0_4 = arith.constant 0 : index
    %3 = vector.load %arg3[%c0_3, %c0_4] : memref<1x64xf32, #tpu.memory_space<vmem>>, vector<1x64xf32>
    %4 = vector.broadcast %3 : vector<1x64xf32> to vector<64x64xf32>
    %5 = arith.addf %2, %4 : vector<64x64xf32>
    %cst_5 = arith.constant 0.000000e+00 : f32
    %6 = vector.broadcast %cst_5 : f32 to vector<64x64xf32>
    %7 = arith.maximumf %5, %6 : vector<64x64xf32>
    %c0_6 = arith.constant 0 : index
    %c0_7 = arith.constant 0 : index
    %8 = vector.load %arg4[%c0_6, %c0_7] : memref<64x64xf32, #tpu.memory_space<vmem>>, vector<64x64xf32>
    %cst_8 = arith.constant dense<0.000000e+00> : vector<64x64xf32>
    %9 = tpu.matmul %7, %8, %cst_8 {dimension_numbers = #tpu.dot_dimension_numbers<[1], [0], [0], [1], [0, 0, 1, 1], [], []>} : vector<64x64xf32>, vector<64x64xf32>, vector<64x64xf32> -> vector<64x64xf32>
    %c0_9 = arith.constant 0 : index
    %c0_10 = arith.constant 0 : index
    %10 = vector.load %arg5[%c0_9, %c0_10] : memref<1x64xf32, #tpu.memory_space<vmem>>, vector<1x64xf32>
    %11 = vector.broadcast %10 : vector<1x64xf32> to vector<64x64xf32>
    %12 = arith.addf %9, %11 : vector<64x64xf32>
    %cst_11 = arith.constant 0.000000e+00 : f32
    %13 = vector.broadcast %cst_11 : f32 to vector<64x64xf32>
    %14 = arith.maximumf %12, %13 : vector<64x64xf32>
    %c0_12 = arith.constant 0 : index
    %c0_13 = arith.constant 0 : index
    %15 = vector.load %arg6[%c0_12, %c0_13] : memref<64x32xf32, #tpu.memory_space<vmem>>, vector<64x32xf32>
    %cst_14 = arith.constant dense<0.000000e+00> : vector<64x32xf32>
    %16 = tpu.matmul %14, %15, %cst_14 {dimension_numbers = #tpu.dot_dimension_numbers<[1], [0], [0], [1], [0, 0, 1, 1], [], []>} : vector<64x64xf32>, vector<64x32xf32>, vector<64x32xf32> -> vector<64x32xf32>
    %c0_15 = arith.constant 0 : index
    %c0_16 = arith.constant 0 : index
    %17 = vector.load %arg7[%c0_15, %c0_16] : memref<1x32xf32, #tpu.memory_space<vmem>>, vector<1x32xf32>
    %18 = vector.broadcast %17 : vector<1x32xf32> to vector<64x32xf32>
    %19 = arith.addf %16, %18 : vector<64x32xf32>
    %cst_17 = arith.constant 0.000000e+00 : f32
    %20 = vector.broadcast %cst_17 : f32 to vector<64x32xf32>
    %21 = arith.maximumf %19, %20 : vector<64x32xf32>
    %c0_18 = arith.constant 0 : index
    %c0_19 = arith.constant 0 : index
    %22 = vector.load %arg8[%c0_18, %c0_19] : memref<32x128xf32, #tpu.memory_space<vmem>>, vector<32x128xf32>
    %cst_20 = arith.constant dense<0.000000e+00> : vector<64x128xf32>
    %23 = tpu.matmul %21, %22, %cst_20 {dimension_numbers = #tpu.dot_dimension_numbers<[1], [0], [0], [1], [0, 0, 1, 1], [], []>} : vector<64x32xf32>, vector<32x128xf32>, vector<64x128xf32> -> vector<64x128xf32>
    %c0_21 = arith.constant 0 : index
    %c0_22 = arith.constant 0 : index
    %24 = vector.load %arg9[%c0_21, %c0_22] : memref<1x128xf32, #tpu.memory_space<vmem>>, vector<1x128xf32>
    %25 = vector.broadcast %24 : vector<1x128xf32> to vector<64x128xf32>
    %26 = arith.addf %23, %25 : vector<64x128xf32>
    %27 = vector.extract_strided_slice %26 {offsets = [0, 0], sizes = [64, 4], strides = [1, 1]} : vector<64x128xf32> to vector<64x4xf32>
    %c0_23 = arith.constant 0 : index
    %c0_24 = arith.constant 0 : index
    %28 = vector.load %arg10[%c0_23, %c0_24] : memref<64x4xf32, #tpu.memory_space<vmem>>, vector<64x4xf32>
    tpu.vector_store %arg10[%c0_23, %c0_24], %27 {strides = array<i32>} : memref<64x4xf32, #tpu.memory_space<vmem>>, vector<64x4xf32>,
    return
  }
  func.func @transform_0(%arg0: i32) -> (i32, i32) {
    %c0_i32 = arith.constant 0 : i32
    %c0_i32_0 = arith.constant 0 : i32
    return %arg0, %c0_i32 : i32, i32
  }
  func.func @transform_1(%arg0: i32) -> (i32, i32) {
    %c0_i32 = arith.constant 0 : i32
    %c0_i32_0 = arith.constant 0 : i32
    %c0_i32_1 = arith.constant 0 : i32
    return %c0_i32, %c0_i32_0 : i32, i32
  }
  func.func @transform_2(%arg0: i32) -> (i32, i32) {
    %c0_i32 = arith.constant 0 : i32
    %c0_i32_0 = arith.constant 0 : i32
    %c0_i32_1 = arith.constant 0 : i32
    return %c0_i32, %c0_i32_0 : i32, i32
  }
  func.func @transform_3(%arg0: i32) -> (i32, i32) {
    %c0_i32 = arith.constant 0 : i32
    %c0_i32_0 = arith.constant 0 : i32
    %c0_i32_1 = arith.constant 0 : i32
    return %c0_i32, %c0_i32_0 : i32, i32
  }
  func.func @transform_4(%arg0: i32) -> (i32, i32) {
    %c0_i32 = arith.constant 0 : i32
    %c0_i32_0 = arith.constant 0 : i32
    %c0_i32_1 = arith.constant 0 : i32
    return %c0_i32, %c0_i32_0 : i32, i32
  }
  func.func @transform_5(%arg0: i32) -> (i32, i32) {
    %c0_i32 = arith.constant 0 : i32
    %c0_i32_0 = arith.constant 0 : i32
    %c0_i32_1 = arith.constant 0 : i32
    return %c0_i32, %c0_i32_0 : i32, i32
  }
  func.func @transform_6(%arg0: i32) -> (i32, i32) {
    %c0_i32 = arith.constant 0 : i32
    %c0_i32_0 = arith.constant 0 : i32
    %c0_i32_1 = arith.constant 0 : i32
    return %c0_i32, %c0_i32_0 : i32, i32
  }
  func.func @transform_7(%arg0: i32) -> (i32, i32) {
    %c0_i32 = arith.constant 0 : i32
    %c0_i32_0 = arith.constant 0 : i32
    %c0_i32_1 = arith.constant 0 : i32
    return %c0_i32, %c0_i32_0 : i32, i32
  }
  func.func @transform_8(%arg0: i32) -> (i32, i32) {
    %c0_i32 = arith.constant 0 : i32
    %c0_i32_0 = arith.constant 0 : i32
    %c0_i32_1 = arith.constant 0 : i32
    return %c0_i32, %c0_i32_0 : i32, i32
  }
  func.func @transform_9(%arg0: i32) -> (i32, i32) {
    %c0_i32 = arith.constant 0 : i32
    %c0_i32_0 = arith.constant 0 : i32
    return %arg0, %c0_i32 : i32, i32
  }
}

</mosaic_0001>

<bundles_post_ra>
// kernel: tpu_custom_call.1
= control target key start
LH: loop header
LB: loop body
LE: loop exit
PB: predicated region body
PF: predicated region fallthrough
CT: control target
= control target key end

     0   :  { %vm48_vm0 = vcmask 261120   ;;  %vm134_vm1 = vcmask 523264   ;;  %vm366_vm2 = vcmask 31744   ;;  %s637_s1 = inlined_call_operand.vmem [shape: f32[32,64], index: 1, kind: input, shape index: {}]   ;;  %s638_s0 = inlined_call_operand.vmem [shape: f32[64,32], index: 0, kind: input, shape index: {}]   ;;  %s639_s2 = inlined_call_operand.vmem [shape: f32[1,64], index: 2, kind: input, shape index: {}]   ;;  %s640_s3 = inlined_call_operand.vmem [shape: f32[64,64], index: 3, kind: input, shape index: {}]   ;;  %s641_s4 = inlined_call_operand.vmem [shape: f32[1,64], index: 4, kind: input, shape index: {}]   ;;  %s642_s5 = inlined_call_operand.vmem [shape: f32[64,32], index: 5, kind: input, shape index: {}]   ;;  %s643_s6 = inlined_call_operand.vmem [shape: f32[1,32], index: 6, kind: input, shape index: {}]   ;;  %s644_s7 = inlined_call_operand.vmem [shape: f32[32,128], index: 7, kind: input, shape index: {}]   ;;  %s645_s8 = inlined_call_operand.vmem [shape: f32[1,128], index: 8, kind: input, shape index: {}]   ;;  %s646_s9 = inlined_call_operand.vmem [shape: f32[64,4], index: 9, kind: output, shape index: {}]  }
   0x1   :  { %v43_v0 = vld [vmem:[%s637_s1 + $0x18] sm:$0xff]  ;;  %v42_v1 = vld [vmem:[%s637_s1 + $0x10] sm:$0xff]  ;;  %v41_v2 = vld [vmem:[%s637_s1 + $0x8] sm:$0xff] }
   0x2   :  { %85 = vmatpush.msra.mxu0 %v43_v0  ;;  %v40_v3 = vld [vmem:[%s637_s1] sm:$0xff]  ;;  %v33_v5 = vld [vmem:[%s638_s0 + $0x8] sm:$0xff]  ;;  %v34_v6 = vld [vmem:[%s638_s0 + $0x10] sm:$0xff] }
   0x3   :  { %v32_v4 = vld [vmem:[%s638_s0] sm:$0xff]  ;;  %v35_v7 = vld [vmem:[%s638_s0 + $0x18] sm:$0xff]  ;;  %v128_v9 = vld [vmem:[%s640_s3 + $0x30] sm:$0xff] }
   0x4   :  { %86 = vmatpush.msra.mxu0 %v42_v1  ;;  %v129_v8 = vld [vmem:[%s640_s3 + $0x38] sm:$0xff]  ;;  %v127_v10 = vld [vmem:[%s640_s3 + $0x28] sm:$0xff]  ;;  %v126_v11 = vld [vmem:[%s640_s3 + $0x20] sm:$0xff] }
   0x5   :  { %167 = vmatpush.msra.mxu1 %v129_v8  ;;  %v36_v12 = vld [vmem:[%s638_s0 + $0x20] sm:$0xff]  ;;  %v125_v13 = vld [vmem:[%s640_s3 + $0x18] sm:$0xff]  ;;  %v37_v14 = vld [vmem:[%s638_s0 + $0x28] sm:$0xff] }
   0x6   :  { %87 = vmatpush.msra.mxu0 %v41_v2  ;;  %v38_v15 = vld [vmem:[%s638_s0 + $0x30] sm:$0xff]  ;;  %v39_v16 = vld [vmem:[%s638_s0 + $0x38] sm:$0xff]  ;;  %v123_v18 = vld [vmem:[%s640_s3 + $0x8] sm:$0xff] }
   0x7   :  { %168 = vmatpush.msra.mxu1 %v128_v9  ;;  %v124_v17 = vld [vmem:[%s640_s3 + $0x10] sm:$0xff]  ;;  %v122_v19 = vld [vmem:[%s640_s3] sm:$0xff]  ;;  %v215_v33 = vld [vmem:[%s642_s5 + $0x38] sm:$0xff] }
   0x8   :  { %88 = vmatpush.msra.mxu0 %v40_v3  ;;  %v411_v20 = vld [vmem:[%s639_s2] ss:$0 sm:$0xff]  ;;  %v214_v34 = vld [vmem:[%s642_s5 + $0x30] sm:$0xff]  ;;  %252 = vmatpush.msra.mxu2 %v215_v33  ;;  %v213_v35 = vld [vmem:[%s642_s5 + $0x28] sm:$0xff] }
   0x9   :  { %379 = vmatmul.msk.f32.vlgmr.msra.gmra.mxu0 %vm48_vm0, %v32_v4  ;;  %169 = vmatpush.msra.mxu1 %v127_v10  ;;  %v212_v38 = vld [vmem:[%s642_s5 + $0x20] sm:$0xff]  ;;  %v211_v40 = vld [vmem:[%s642_s5 + $0x18] sm:$0xff]  ;;  %v210_v50 = vld [vmem:[%s642_s5 + $0x10] sm:$0xff] }
   0xa   :  { %253 = vmatpush.msra.mxu2 %v214_v34  ;;  %v209_v51 = vld [vmem:[%s642_s5 + $0x8] sm:$0xff]  ;;  %v208_v52 = vld [vmem:[%s642_s5] sm:$0xff]  ;;  %v296_v2 = vld [vmem:[%s644_s7 + $0x18] sm:$0xff] }
   0xb   :  { %170 = vmatpush.msra.mxu1 %v126_v11  ;;  %v412_v53 = vld [vmem:[%s641_s4] ss:$0 sm:$0xff]  ;;  %337 = vmatpush.msra.mxu3 %v296_v2 }
   0xc   :  { %254 = vmatpush.msra.mxu2 %v213_v35 }
   0xd   :  { %171 = vmatpush.msra.mxu1 %v125_v13 }
   0xe   :  { %255 = vmatpush.msra.mxu2 %v212_v38 }
   0xf   :  { %172 = vmatpush.msra.mxu1 %v124_v17  ;;  %v293_v17 = vld [vmem:[%s644_s7] sm:$0xff] }
  0x10   :  { %256 = vmatpush.msra.mxu2 %v211_v40 }
  0x11   :  { %380 = vmatmul.msk.f32.gmra.mxu0 %vm48_vm0, %v33_v5  ;;  %173 = vmatpush.msra.mxu1 %v123_v18  ;;  %v413_v18 = vld [vmem:[%s643_s6] ss:$0 sm:$0xff] }
  0x12   :  { %257 = vmatpush.msra.mxu2 %v210_v50 }
  0x13   :  { %174 = vmatpush.msra.mxu1 %v122_v19 }
  0x14   :  { %258 = vmatpush.msra.mxu2 %v209_v51 }
  0x16   :  { %259 = vmatpush.msra.mxu2 %v208_v52 }
  0x19   :  { %381 = vmatmul.msk.f32.gmra.mxu0 %vm48_vm0, %v34_v6 }
  0x21   :  { %382 = vmatmul.msk.f32.gmra.mxu0 %vm48_vm0, %v35_v7 }
  0x29   :  { %383 = vmatmul.msk.f32.gmra.mxu0 %vm48_vm0, %v36_v12 }
  0x31   :  { %384 = vmatmul.msk.f32.gmra.mxu0 %vm48_vm0, %v37_v14 }
  0x39   :  { %385 = vmatmul.msk.f32.gmra.mxu0 %vm48_vm0, %v38_v15  ;;  %v295_v15 = vld [vmem:[%s644_s7 + $0x10] sm:$0xff] }
  0x3a   :  { %338 = vmatpush.msra.mxu3 %v295_v15 }
  0x41   :  { %386 = vmatmul.msk.f32.gmra.mxu0 %vm48_vm0, %v39_v16  ;;  %v294_v16 = vld [vmem:[%s644_s7 + $0x8] sm:$0xff] }
  0x42   :  { %339 = vmatpush.msra.mxu3 %v294_v16 }
  0x44   :  { %340 = vmatpush.msra.mxu3 %v293_v17 }
  0x86   :  { %v90_v21 = vpop.f32.mrf.mxu0 }
  0x87   :  { %v91_v22 = vadd.f32 %v411_v20, %v90_v21 }
  0x89   :  { %v114_v23 = vmax.f32 %v91_v22, 0.0 }
  0x8b   :  { %387 = vmatmul.msk.f32.vlgmr.msra.gmra.mxu1 %vm134_vm1, %v114_v23 }
  0x8e   :  { %v93_v24 = vpop.f32.mrf.mxu0 }
  0x8f   :  { %v94_v25 = vadd.f32 %v411_v20, %v93_v24 }
  0x91   :  { %v115_v26 = vmax.f32 %v94_v25, 0.0 }
  0x93   :  { %388 = vmatmul.msk.f32.gmra.mxu1 %vm134_vm1, %v115_v26 }
  0x96   :  { %v96_v27 = vpop.f32.mrf.mxu0 }
  0x97   :  { %v97_v28 = vadd.f32 %v411_v20, %v96_v27 }
  0x99   :  { %v116_v29 = vmax.f32 %v97_v28, 0.0 }
  0x9b   :  { %389 = vmatmul.msk.f32.gmra.mxu1 %vm134_vm1, %v116_v29 }
  0x9e   :  { %v99_v30 = vpop.f32.mrf.mxu0 }
  0x9f   :  { %v100_v31 = vadd.f32 %v411_v20, %v99_v30 }
  0xa1   :  { %v117_v32 = vmax.f32 %v100_v31, 0.0 }
  0xa3   :  { %390 = vmatmul.msk.f32.gmra.mxu1 %vm134_vm1, %v117_v32 }
  0xa6   :  { %v102_v36 = vpop.f32.mrf.mxu0 }
  0xa7   :  { %v103_v37 = vadd.f32 %v411_v20, %v102_v36 }
  0xa9   :  { %v118_v39 = vmax.f32 %v103_v37, 0.0 }
  0xab   :  { %391 = vmatmul.msk.f32.gmra.mxu1 %vm134_vm1, %v118_v39 }
  0xae   :  { %v105_v41 = vpop.f32.mrf.mxu0 }
  0xaf   :  { %v106_v42 = vadd.f32 %v411_v20, %v105_v41 }
  0xb1   :  { %v119_v43 = vmax.f32 %v106_v42, 0.0 }
  0xb3   :  { %392 = vmatmul.msk.f32.gmra.mxu1 %vm134_vm1, %v119_v43  ;;  %v414_v43 = vld [vmem:[%s645_s8] ss:$0 sm:$0xff] }
  0xb6   :  { %v108_v44 = vpop.f32.mrf.mxu0 }
  0xb7   :  { %v109_v45 = vadd.f32 %v411_v20, %v108_v44 }
  0xb9   :  { %v120_v46 = vmax.f32 %v109_v45, 0.0 }
  0xbb   :  { %393 = vmatmul.msk.f32.gmra.mxu1 %vm134_vm1, %v120_v46 }
  0xbe   :  { %v111_v47 = vpop.f32.mrf.mxu0 }
  0xbf   :  { %v112_v48 = vadd.f32 %v411_v20, %v111_v47 }
  0xc1   :  { %v121_v49 = vmax.f32 %v112_v48, 0.0 }
  0xc3   :  { %394 = vmatmul.msk.f32.gmra.mxu1 %vm134_vm1, %v121_v49 }
 0x108   :  { %v176_v54 = vpop.f32.mrf.mxu1 }
 0x109   :  { %v177_v55 = vadd.f32 %v412_v53, %v176_v54 }
 0x10b   :  { %v200_v56 = vmax.f32 %v177_v55, 0.0 }
 0x10d   :  { %395 = vmatmul.msk.f32.vlgmr.msra.gmra.mxu2 %vm134_vm1, %v200_v56 }
 0x110   :  { %v179_v57 = vpop.f32.mrf.mxu1 }
 0x111   :  { %v180_v58 = vadd.f32 %v412_v53, %v179_v57 }
 0x113   :  { %v201_v59 = vmax.f32 %v180_v58, 0.0 }
 0x115   :  { %396 = vmatmul.msk.f32.gmra.mxu2 %vm134_vm1, %v201_v59 }
 0x118   :  { %v182_v60 = vpop.f32.mrf.mxu1 }
 0x119   :  { %v183_v61 = vadd.f32 %v412_v53, %v182_v60 }
 0x11b   :  { %v202_v62 = vmax.f32 %v183_v61, 0.0 }
 0x11d   :  { %397 = vmatmul.msk.f32.gmra.mxu2 %vm134_vm1, %v202_v62 }
 0x120   :  { %v185_v63 = vpop.f32.mrf.mxu1 }
 0x121   :  { %v186_v0 = vadd.f32 %v412_v53, %v185_v63 }
 0x123   :  { %v203_v1 = vmax.f32 %v186_v0, 0.0 }
 0x125   :  { %398 = vmatmul.msk.f32.gmra.mxu2 %vm134_vm1, %v203_v1 }
 0x128   :  { %v188_v3 = vpop.f32.mrf.mxu1 }
 0x129   :  { %v189_v4 = vadd.f32 %v412_v53, %v188_v3 }
 0x12b   :  { %v204_v5 = vmax.f32 %v189_v4, 0.0 }
 0x12d   :  { %399 = vmatmul.msk.f32.gmra.mxu2 %vm134_vm1, %v204_v5 }
 0x130   :  { %v191_v6 = vpop.f32.mrf.mxu1 }
 0x131   :  { %v192_v7 = vadd.f32 %v412_v53, %v191_v6 }
 0x133   :  { %v205_v8 = vmax.f32 %v192_v7, 0.0 }
 0x135   :  { %400 = vmatmul.msk.f32.gmra.mxu2 %vm134_vm1, %v205_v8 }
 0x138   :  { %v194_v9 = vpop.f32.mrf.mxu1 }
 0x139   :  { %v195_v10 = vadd.f32 %v412_v53, %v194_v9 }
 0x13b   :  { %v206_v11 = vmax.f32 %v195_v10, 0.0 }
 0x13d   :  { %401 = vmatmul.msk.f32.gmra.mxu2 %vm134_vm1, %v206_v11 }
 0x140   :  { %v197_v12 = vpop.f32.mrf.mxu1 }
 0x141   :  { %v198_v13 = vadd.f32 %v412_v53, %v197_v12 }
 0x143   :  { %v207_v14 = vmax.f32 %v198_v13, 0.0 }
 0x145   :  { %402 = vmatmul.msk.f32.gmra.mxu2 %vm134_vm1, %v207_v14 }
 0x190   :  { %v261_v19 = vpop.f32.mrf.mxu2 }
 0x191   :  { %v262_v20 = vadd.f32 %v413_v18, %v261_v19 }
 0x193   :  { %v285_v21 = vmax.f32 %v262_v20, 0.0 }
 0x195   :  { %403 = vmatmul.msk.f32.vlgmr.msra.gmra.mxu3 %vm48_vm0, %v285_v21 }
 0x198   :  { %v264_v22 = vpop.f32.mrf.mxu2 }
 0x199   :  { %v265_v23 = vadd.f32 %v413_v18, %v264_v22 }
 0x19b   :  { %v286_v24 = vmax.f32 %v265_v23, 0.0 }
 0x19d   :  { %404 = vmatmul.msk.f32.gmra.mxu3 %vm48_vm0, %v286_v24 }
 0x1a0   :  { %v267_v25 = vpop.f32.mrf.mxu2 }
 0x1a1   :  { %v268_v26 = vadd.f32 %v413_v18, %v267_v25 }
 0x1a3   :  { %v287_v27 = vmax.f32 %v268_v26, 0.0 }
 0x1a5   :  { %405 = vmatmul.msk.f32.gmra.mxu3 %vm48_vm0, %v287_v27 }
 0x1a8   :  { %v270_v28 = vpop.f32.mrf.mxu2 }
 0x1a9   :  { %v271_v29 = vadd.f32 %v413_v18, %v270_v28 }
 0x1ab   :  { %v288_v30 = vmax.f32 %v271_v29, 0.0 }
 0x1ad   :  { %406 = vmatmul.msk.f32.gmra.mxu3 %vm48_vm0, %v288_v30 }
 0x1b0   :  { %v273_v31 = vpop.f32.mrf.mxu2 }
 0x1b1   :  { %v274_v32 = vadd.f32 %v413_v18, %v273_v31 }
 0x1b3   :  { %v289_v33 = vmax.f32 %v274_v32, 0.0 }
 0x1b5   :  { %407 = vmatmul.msk.f32.gmra.mxu3 %vm48_vm0, %v289_v33 }
 0x1b8   :  { %v276_v34 = vpop.f32.mrf.mxu2 }
 0x1b9   :  { %v277_v35 = vadd.f32 %v413_v18, %v276_v34 }
 0x1bb   :  { %v290_v36 = vmax.f32 %v277_v35, 0.0 }
 0x1bd   :  { %408 = vmatmul.msk.f32.gmra.mxu3 %vm48_vm0, %v290_v36 }
 0x1c0   :  { %v279_v37 = vpop.f32.mrf.mxu2 }
 0x1c1   :  { %v280_v38 = vadd.f32 %v413_v18, %v279_v37 }
 0x1c3   :  { %v291_v39 = vmax.f32 %v280_v38, 0.0 }
 0x1c5   :  { %409 = vmatmul.msk.f32.gmra.mxu3 %vm48_vm0, %v291_v39 }
 0x1c8   :  { %v282_v40 = vpop.f32.mrf.mxu2 }
 0x1c9   :  { %v283_v41 = vadd.f32 %v413_v18, %v282_v40 }
 0x1cb   :  { %v292_v42 = vmax.f32 %v283_v41, 0.0 }
 0x1cd   :  { %410 = vmatmul.msk.f32.gmra.mxu3 %vm48_vm0, %v292_v42 }
 0x218   :  { %v342_v44 = vpop.f32.mrf.mxu3 }
 0x219   :  { %v343_v45 = vadd.f32 %v414_v43, %v342_v44 }
 0x21b   :  { %367 = vst.msk [vmem:[%s646_s9] sm:$0xff] %vm366_vm2, %v343_v45 }
 0x220   :  { %v345_v46 = vpop.f32.mrf.mxu3 }
 0x221   :  { %v346_v47 = vadd.f32 %v414_v43, %v345_v46 }
 0x223   :  { %368 = vst.msk [vmem:[%s646_s9 + $0x8] sm:$0xff] %vm366_vm2, %v346_v47 }
 0x228   :  { %v348_v48 = vpop.f32.mrf.mxu3 }
 0x229   :  { %v349_v49 = vadd.f32 %v414_v43, %v348_v48 }
 0x22b   :  { %369 = vst.msk [vmem:[%s646_s9 + $0x10] sm:$0xff] %vm366_vm2, %v349_v49 }
 0x230   :  { %v351_v50 = vpop.f32.mrf.mxu3 }
 0x231   :  { %v352_v51 = vadd.f32 %v414_v43, %v351_v50 }
 0x233   :  { %370 = vst.msk [vmem:[%s646_s9 + $0x18] sm:$0xff] %vm366_vm2, %v352_v51 }
 0x238   :  { %v354_v52 = vpop.f32.mrf.mxu3 }
 0x239   :  { %v355_v53 = vadd.f32 %v414_v43, %v354_v52 }
 0x23b   :  { %371 = vst.msk [vmem:[%s646_s9 + $0x20] sm:$0xff] %vm366_vm2, %v355_v53 }
 0x240   :  { %v357_v54 = vpop.f32.mrf.mxu3 }
 0x241   :  { %v358_v55 = vadd.f32 %v414_v43, %v357_v54 }
 0x243   :  { %372 = vst.msk [vmem:[%s646_s9 + $0x28] sm:$0xff] %vm366_vm2, %v358_v55 }
 0x248   :  { %v360_v56 = vpop.f32.mrf.mxu3 }
 0x249   :  { %v361_v57 = vadd.f32 %v414_v43, %v360_v56 }
 0x24b   :  { %373 = vst.msk [vmem:[%s646_s9 + $0x30] sm:$0xff] %vm366_vm2, %v361_v57 }
 0x250   :  { %v363_v58 = vpop.f32.mrf.mxu3 }
 0x251   :  { %v364_v59 = vadd.f32 %v414_v43, %v363_v58 }
 0x253   :  { %374 = vst.msk [vmem:[%s646_s9 + $0x38] sm:$0xff] %vm366_vm2, %v364_v59 }

</bundles_post_ra>
